<compile_context>
chip_gen: v7x
topology: tpu7x:2x2x1
jax: 0.10.0
libtpu: 0.0.40
codegen_flags: <defaults>
</compile_context>

<pallas_src>
import math

import jax
import jax.numpy as jnp
from jax.experimental import pallas as pl
from jax.experimental.pallas import tpu as pltpu

# Logical (PyTorch) feature dims; only the N (output) dims are lane-padded.
IN_F, H1_F, H2_F, OUT_F = 28 * 28, 500, 256, 10      # 784, 500, 256, 10
H1_P, H2_P, OUT_P = 512, 256, 128                    # 128-multiples


def _round_up(n, m):
    return (n + m - 1) // m * m


def _mlp_kernel(x_ref, w1_ref, b1_ref, w2_ref, b2_ref, w3_ref, b3_ref, o_ref):
    # One (TB, 784) f32 batch tile per grid step. Weights/biases are
    # VMEM-resident (constant index_map) for the whole grid. Three bf16 MXU
    # matmuls with f32 accumulation; VPU cast/bias/ReLU work co-issues under
    # the MXU. The whole layer stack fits in VMEM, so no K-reduction axis.
    x = x_ref[...].astype(jnp.bfloat16)                               # (TB, 784)

    h1 = jnp.dot(x, w1_ref[...], preferred_element_type=jnp.float32)
    h1 = jnp.maximum(h1 + b1_ref[...], 0.0).astype(jnp.bfloat16)      # ReLU(fc1)

    h2 = jnp.dot(h1, w2_ref[...], preferred_element_type=jnp.float32)
    h2 = jnp.maximum(h2 + b2_ref[...], 0.0).astype(jnp.bfloat16)      # ReLU(fc2)

    h3 = jnp.dot(h2, w3_ref[...], preferred_element_type=jnp.float32)
    o_ref[...] = (h3 + b3_ref[...]).astype(o_ref.dtype)               # fc3 logits


def init_params(key):
    """Unpadded f32 params; init matches nn.Linear default U(-1/sqrt(fan_in), +)."""
    dims = [(IN_F, H1_F), (H1_F, H2_F), (H2_F, OUT_F)]
    params = []
    for i, (fan_in, fan_out) in enumerate(dims):
        kw, kb = jax.random.split(jax.random.fold_in(key, i))
        bound = 1.0 / math.sqrt(fan_in)
        # Stored as (in, out): transpose of PyTorch's (out, in) weight.
        w = jax.random.uniform(kw, (fan_in, fan_out), jnp.float32, -bound, bound)
        b = jax.random.uniform(kb, (1, fan_out), jnp.float32, -bound, bound)
        params += [w, b]
    return tuple(params)


def prepare_params(params):
    """Zero-pad N dims to lane-aligned shapes; weights -> bf16, biases stay f32."""
    w1, b1, w2, b2, w3, b3 = params

    def pad_w(w, k_pad, n_pad):
        out = jnp.zeros((k_pad, n_pad), jnp.bfloat16)
        return out.at[: w.shape[0], : w.shape[1]].set(w.astype(jnp.bfloat16))

    def pad_b(b, n_pad):
        out = jnp.zeros((1, n_pad), jnp.float32)
        return out.at[:, : b.shape[1]].set(b.astype(jnp.float32))

    return (
        pad_w(w1, IN_F, H1_P), pad_b(b1, H1_P),     # (784, 512): no K pad
        pad_w(w2, H1_P, H2_P), pad_b(b2, H2_P),     # (512, 256)
        pad_w(w3, H2_P, OUT_P), pad_b(b3, OUT_P),   # (256, 128)
    )


def _choose_batch_tile(B, max_tile):
    # B <= 8: block equals the full batch dim (exempt from the /8 rule).
    if B <= 8:
        return B
    # Multiple of 8 (sublane), capped at max_tile, and sized so the grid has
    # at least 2 steps -> the "parallel" axis shards across v7x's two TCs.
    return min(max_tile, _round_up(pl.cdiv(B, 2), 8))


def nnet_forward(x, padded_params, *, max_batch_tile=1024):
    """x: (B, 1, 28, 28) or (B, 784) float32. Returns (B, 10) float32."""
    w1, b1, w2, b2, w3, b3 = padded_params

    x2d = x.reshape(-1, IN_F)                         # x.view(-1, 28*28)
    B = x2d.shape[0]

    TB = _choose_batch_tile(B, max_batch_tile)
    grid = (pl.cdiv(B, TB),)                          # partial trailing block OK

    # Resident (non-tiled) specs: constant block index across the grid.
    # NOTE: pl.Buffered(1) on these would free ~1.2 MiB of VMEM but is not
    # needed -- total VMEM stays well under the explicit 32 MiB limit.
    resident = lambda shape: pl.BlockSpec(shape, lambda i: (0, 0))

    flops = 2 * B * (IN_F * H1_P + H1_P * H2_P + H2_P * OUT_P)
    bytes_accessed = (
        (w1.size + w2.size + w3.size) * 2             # bf16 weights (one pass)
        + (b1.size + b2.size + b3.size) * 4           # f32 biases
        + B * IN_F * 4                                # f32 input read
        + B * OUT_P * 2                               # bf16 logits written
    )

    out = pl.pallas_call(
        _mlp_kernel,
        out_shape=jax.ShapeDtypeStruct((B, OUT_P), jnp.bfloat16),
        grid=grid,
        in_specs=[
            pl.BlockSpec((TB, IN_F), lambda i: (i, 0)),     # f32 input tile
            resident((IN_F, H1_P)), resident((1, H1_P)),
            resident((H1_P, H2_P)), resident((1, H2_P)),
            resident((H2_P, OUT_P)), resident((1, OUT_P)),
        ],
        out_specs=pl.BlockSpec((TB, OUT_P), lambda i: (i, 0)),
        compiler_params=pltpu.CompilerParams(
            dimension_semantics=("parallel",),
            vmem_limit_bytes=32 * 1024 * 1024,        # covers v5e's 16 MiB default
        ),
        cost_estimate=pl.CostEstimate(
            flops=flops, transcendentals=0, bytes_accessed=bytes_accessed),
    )(x2d, w1, b1, w2, b2, w3, b3)

    return out[:, :OUT_F].astype(jnp.float32)


def _reference(x, params):
    """Pure-JAX reference with the same bf16-input / f32-accumulate numerics."""
    w1, b1, w2, b2, w3, b3 = params
    h = x.reshape(-1, IN_F).astype(jnp.bfloat16)
    h = jnp.dot(h, w1.astype(jnp.bfloat16), preferred_element_type=jnp.float32) + b1
    h = jnp.maximum(h, 0.0).astype(jnp.bfloat16)
    h = jnp.dot(h, w2.astype(jnp.bfloat16), preferred_element_type=jnp.float32) + b2
    h = jnp.maximum(h, 0.0).astype(jnp.bfloat16)
    return jnp.dot(h, w3.astype(jnp.bfloat16), preferred_element_type=jnp.float32) + b3


if __name__ == "__main__":
    key = jax.random.PRNGKey(0)
    k_x, k_p = jax.random.split(key)

    # Small batch of MNIST-shaped images, NCHW like the PyTorch module expects.
    x = jax.random.normal(k_x, (2, 1, 28, 28), dtype=jnp.float32)
    params = init_params(k_p)
    padded_params = prepare_params(params)

    out = jax.block_until_ready(nnet_forward(x, padded_params))

    ref = _reference(x, params)
    assert out.shape == (2, 10)
    assert jnp.allclose(out, ref, atol=3e-2, rtol=3e-2)

    # TODO(synk): the PyTorch forward's `print(x.shape)` debug print is not
    # reproduced inside the kernel.
    print("KERNEL_OK")
</pallas_src>

<mosaic_0001>
module attributes {stable_mosaic.version = 11 : i64} {
  func.func @_mlp_kernel(%arg0: i32, %arg1: memref<2x784xf32, #tpu.memory_space<vmem>>, %arg2: memref<784x512xbf16, #tpu.memory_space<vmem>>, %arg3: memref<1x512xf32, #tpu.memory_space<vmem>>, %arg4: memref<512x256xbf16, #tpu.memory_space<vmem>>, %arg5: memref<1x256xf32, #tpu.memory_space<vmem>>, %arg6: memref<256x128xbf16, #tpu.memory_space<vmem>>, %arg7: memref<1x128xf32, #tpu.memory_space<vmem>>, %arg8: memref<2x128xbf16, #tpu.memory_space<vmem>>) attributes {dimension_semantics = [#tpu.dimension_semantics<parallel>], iteration_bounds = array<i64: 1>, scalar_prefetch = 0 : i64, scratch_operands = 0 : i64, tpu.core_type = #tpu.core_type<tc>, window_params = [{transform_indices = @transform_0, window_bounds = array<i64: 2, 784>}, {pipeline_mode = #tpu.pipeline_mode<synchronous>, transform_indices = @transform_1, window_bounds = array<i64: 784, 512>}, {pipeline_mode = #tpu.pipeline_mode<synchronous>, transform_indices = @transform_2, window_bounds = array<i64: 1, 512>}, {pipeline_mode = #tpu.pipeline_mode<synchronous>, transform_indices = @transform_3, window_bounds = array<i64: 512, 256>}, {pipeline_mode = #tpu.pipeline_mode<synchronous>, transform_indices = @transform_4, window_bounds = array<i64: 1, 256>}, {pipeline_mode = #tpu.pipeline_mode<synchronous>, transform_indices = @transform_5, window_bounds = array<i64: 256, 128>}, {pipeline_mode = #tpu.pipeline_mode<synchronous>, transform_indices = @transform_6, window_bounds = array<i64: 1, 128>}, {transform_indices = @transform_7, window_bounds = array<i64: 2, 128>}]} {
    %c0 = arith.constant 0 : index
    %c0_0 = arith.constant 0 : index
    %0 = vector.load %arg1[%c0, %c0_0] : memref<2x784xf32, #tpu.memory_space<vmem>>, vector<2x784xf32>
    %1 = arith.truncf %0 : vector<2x784xf32> to vector<2x784xbf16>
    %c0_1 = arith.constant 0 : index
    %c0_2 = arith.constant 0 : index
    %2 = vector.load %arg2[%c0_1, %c0_2] : memref<784x512xbf16, #tpu.memory_space<vmem>>, vector<784x512xbf16>
    %cst = arith.constant dense<0.000000e+00> : vector<2x512xf32>
    %3 = tpu.matmul %1, %2, %cst {dimension_numbers = #tpu.dot_dimension_numbers<[1], [0], [0], [1], [0, 0, 1, 1], [], []>} : vector<2x784xbf16>, vector<784x512xbf16>, vector<2x512xf32> -> vector<2x512xf32>
    %c0_3 = arith.constant 0 : index
    %c0_4 = arith.constant 0 : index
    %4 = vector.load %arg3[%c0_3, %c0_4] : memref<1x512xf32, #tpu.memory_space<vmem>>, vector<1x512xf32>
    %5 = vector.broadcast %4 : vector<1x512xf32> to vector<2x512xf32>
    %6 = arith.addf %3, %5 : vector<2x512xf32>
    %cst_5 = arith.constant 0.000000e+00 : f32
    %7 = vector.broadcast %cst_5 : f32 to vector<2x512xf32>
    %8 = arith.maximumf %6, %7 : vector<2x512xf32>
    %9 = arith.truncf %8 : vector<2x512xf32> to vector<2x512xbf16>
    %c0_6 = arith.constant 0 : index
    %c0_7 = arith.constant 0 : index
    %10 = vector.load %arg4[%c0_6, %c0_7] : memref<512x256xbf16, #tpu.memory_space<vmem>>, vector<512x256xbf16>
    %cst_8 = arith.constant dense<0.000000e+00> : vector<2x256xf32>
    %11 = tpu.matmul %9, %10, %cst_8 {dimension_numbers = #tpu.dot_dimension_numbers<[1], [0], [0], [1], [0, 0, 1, 1], [], []>} : vector<2x512xbf16>, vector<512x256xbf16>, vector<2x256xf32> -> vector<2x256xf32>
    %c0_9 = arith.constant 0 : index
    %c0_10 = arith.constant 0 : index
    %12 = vector.load %arg5[%c0_9, %c0_10] : memref<1x256xf32, #tpu.memory_space<vmem>>, vector<1x256xf32>
    %13 = vector.broadcast %12 : vector<1x256xf32> to vector<2x256xf32>
    %14 = arith.addf %11, %13 : vector<2x256xf32>
    %cst_11 = arith.constant 0.000000e+00 : f32
    %15 = vector.broadcast %cst_11 : f32 to vector<2x256xf32>
    %16 = arith.maximumf %14, %15 : vector<2x256xf32>
    %17 = arith.truncf %16 : vector<2x256xf32> to vector<2x256xbf16>
    %c0_12 = arith.constant 0 : index
    %c0_13 = arith.constant 0 : index
    %18 = vector.load %arg6[%c0_12, %c0_13] : memref<256x128xbf16, #tpu.memory_space<vmem>>, vector<256x128xbf16>
    %cst_14 = arith.constant dense<0.000000e+00> : vector<2x128xf32>
    %19 = tpu.matmul %17, %18, %cst_14 {dimension_numbers = #tpu.dot_dimension_numbers<[1], [0], [0], [1], [0, 0, 1, 1], [], []>} : vector<2x256xbf16>, vector<256x128xbf16>, vector<2x128xf32> -> vector<2x128xf32>
    %c0_15 = arith.constant 0 : index
    %c0_16 = arith.constant 0 : index
    %20 = vector.load %arg7[%c0_15, %c0_16] : memref<1x128xf32, #tpu.memory_space<vmem>>, vector<1x128xf32>
    %21 = vector.broadcast %20 : vector<1x128xf32> to vector<2x128xf32>
    %22 = arith.addf %19, %21 : vector<2x128xf32>
    %23 = arith.truncf %22 : vector<2x128xf32> to vector<2x128xbf16>
    %c0_17 = arith.constant 0 : index
    %c0_18 = arith.constant 0 : index
    %24 = vector.load %arg8[%c0_17, %c0_18] : memref<2x128xbf16, #tpu.memory_space<vmem>>, vector<2x128xbf16>
    tpu.vector_store %arg8[%c0_17, %c0_18], %23 {strides = array<i32>} : memref<2x128xbf16, #tpu.memory_space<vmem>>, vector<2x128xbf16>,
    return
  }
  func.func @transform_0(%arg0: i32) -> (i32, i32) {
    %c0_i32 = arith.constant 0 : i32
    %c0_i32_0 = arith.constant 0 : i32
    return %arg0, %c0_i32 : i32, i32
  }
  func.func @transform_1(%arg0: i32) -> (i32, i32) {
    %c0_i32 = arith.constant 0 : i32
    %c0_i32_0 = arith.constant 0 : i32
    %c0_i32_1 = arith.constant 0 : i32
    return %c0_i32, %c0_i32_0 : i32, i32
  }
  func.func @transform_2(%arg0: i32) -> (i32, i32) {
    %c0_i32 = arith.constant 0 : i32
    %c0_i32_0 = arith.constant 0 : i32
    %c0_i32_1 = arith.constant 0 : i32
    return %c0_i32, %c0_i32_0 : i32, i32
  }
  func.func @transform_3(%arg0: i32) -> (i32, i32) {
    %c0_i32 = arith.constant 0 : i32
    %c0_i32_0 = arith.constant 0 : i32
    %c0_i32_1 = arith.constant 0 : i32
    return %c0_i32, %c0_i32_0 : i32, i32
  }
  func.func @transform_4(%arg0: i32) -> (i32, i32) {
    %c0_i32 = arith.constant 0 : i32
    %c0_i32_0 = arith.constant 0 : i32
    %c0_i32_1 = arith.constant 0 : i32
    return %c0_i32, %c0_i32_0 : i32, i32
  }
  func.func @transform_5(%arg0: i32) -> (i32, i32) {
    %c0_i32 = arith.constant 0 : i32
    %c0_i32_0 = arith.constant 0 : i32
    %c0_i32_1 = arith.constant 0 : i32
    return %c0_i32, %c0_i32_0 : i32, i32
  }
  func.func @transform_6(%arg0: i32) -> (i32, i32) {
    %c0_i32 = arith.constant 0 : i32
    %c0_i32_0 = arith.constant 0 : i32
    %c0_i32_1 = arith.constant 0 : i32
    return %c0_i32, %c0_i32_0 : i32, i32
  }
  func.func @transform_7(%arg0: i32) -> (i32, i32) {
    %c0_i32 = arith.constant 0 : i32
    %c0_i32_0 = arith.constant 0 : i32
    return %arg0, %c0_i32 : i32, i32
  }
}

</mosaic_0001>

<bundles_post_ra>
// kernel: tpu_custom_call.1
= control target key start
LH: loop header
LB: loop body
LE: loop exit
PB: predicated region body
PF: predicated region fallthrough
CT: control target
= control target key end

     0   :  { %12 = vsyncpa [#allocation3], 0  ;;  %s3402_s0 = inlined_call_operand.hbm [shape: f32[2,784], index: 0, kind: input, shape index: {}]   ;;  %s3403_s1 = inlined_call_operand.hbm [shape: bf16[784,512], index: 1, kind: input, shape index: {}]   ;;  %s3404_s2 = inlined_call_operand.vmem [shape: f32[1,512], index: 2, kind: input, shape index: {}]   ;;  %s3405_s3 = inlined_call_operand.hbm [shape: bf16[512,256], index: 3, kind: input, shape index: {}]   ;;  %s3406_s4 = inlined_call_operand.vmem [shape: f32[1,256], index: 4, kind: input, shape index: {}]   ;;  %s3407_s5 = inlined_call_operand.hbm [shape: bf16[256,128], index: 5, kind: input, shape index: {}]   ;;  %s3408_s6 = inlined_call_operand.vmem [shape: f32[1,128], index: 6, kind: input, shape index: {}]   ;;  %s3409_s7 = inlined_call_operand.hbm [shape: bf16[2,128], index: 7, kind: output, shape index: {}]  }
   0x1   :  { %13 = vsyncpa [#allocation6], 0 }
   0x2   :  { %14 = vsyncpa [#allocation9], 0 }
   0x3   :  { %15 = vsyncpa [#allocation4], 0  ;;  %s3216_s24 = smov [#allocation5]   ;;  %s3098_s28 = scalar_lea.hbm %s3403_s1, 25088 }
   0x4   :  { %s31_s25 = sshll.u32 %s3216_s24, 4  ;;  %p3099_p0 = scmp.ne.s32.totalorder %s3403_s1, %s3098_s28  ;;  %s32_s25 = int_to_ptr.vmem [resolvable:$true] %s31_s25 }
   0x5   :  { %p3102_p1 = scmp.lt.u32.totalorder %s3098_s28, %s3403_s1 }
   0x7   :  { %p3104_p2 = pnand %p3102_p1, %p3099_p0 }
   0x9   :  { %3107 = shalt.err (!%p3104_p2)
}
   0xa   :  { %s3108_s10 = scalar_lea.vmem %s32_s25, 25088  ;;  %p3113_p4 = scmp.lt.s32.totalorder %s32_s25, %s32_s25 }
   0xb   :  { %p3109_p3 = scmp.ne.s32.totalorder %s32_s25, %s3108_s10  ;;  %p3114_p5 = scmp.lt.s32.totalorder %s3108_s10, %s3108_s10 }
   0xd   :  { %p3115_p6 = por %p3114_p5, %p3113_p4 }
   0xf   :  { %p3116_p7 = pnand %p3115_p6, %p3109_p3 }
  0x11   :  { %3119 = shalt.err (!%p3116_p7)
}
  0x12   :  { %s3217_s11 = smov 256   ;;  %s3218_s12 = smov 16  }
  0x13   :  { %37 = dma.hbm_to_vmem [thread:$0]  %s3403_s1, 25088, %s32_s25, [#allocation6], %s3217_s11, %s3217_s11, %s3218_s12  }
  0x14   :  { %s3219_s15 = smov [#allocation2]   ;;  %s3220_s17 = smov [#allocation7]  }
  0x15   :  { %s22_s16 = sshll.u32 %s3219_s15, 4  ;;  %s45_s18 = sshll.u32 %s3220_s17, 4  ;;  %s23_s16 = int_to_ptr.vmem [resolvable:$true] %s22_s16  ;;  %s46_s18 = int_to_ptr.vmem [resolvable:$true] %s45_s18 }
  0x16   :  { %s3120_s21 = scalar_lea.hbm %s3402_s0, 224 }
  0x17   :  { %p3121_p8 = scmp.ne.s32.totalorder %s3402_s0, %s3120_s21  ;;  %p3124_p9 = scmp.lt.u32.totalorder %s3120_s21, %s3402_s0 }
  0x19   :  { %p3126_p10 = pnand %p3124_p9, %p3121_p8 }
  0x1b   :  { %3129 = shalt.err (!%p3126_p10)
}
  0x1c   :  { %s3130_s1 = scalar_lea.vmem %s23_s16, 224  ;;  %p3135_p12 = scmp.lt.s32.totalorder %s23_s16, %s23_s16 }
  0x1d   :  { %p3131_p11 = scmp.ne.s32.totalorder %s23_s16, %s3130_s1  ;;  %p3136_p13 = scmp.lt.s32.totalorder %s3130_s1, %s3130_s1 }
  0x1f   :  { %p3137_p0 = por %p3136_p13, %p3135_p12 }
  0x21   :  { %p3138_p1 = pnand %p3137_p0, %p3131_p11 }
  0x23   :  { %3141 = shalt.err (!%p3138_p1)
}
  0x24   :  { %25 = dma.hbm_to_vmem [thread:$0]  %s3402_s0, 224, %s23_s16, [#allocation3]  }
  0x25   :  { %s3142_s30 = scalar_lea.hbm %s3405_s3, 8192 }
  0x26   :  { %p3143_p2 = scmp.ne.s32.totalorder %s3405_s3, %s3142_s30  ;;  %p3146_p3 = scmp.lt.u32.totalorder %s3142_s30, %s3405_s3 }
  0x28   :  { %p3148_p4 = pnand %p3146_p3, %p3143_p2 }
  0x2a   :  { %3151 = shalt.err (!%p3148_p4)
}
  0x2b   :  { %s3152_s12 = scalar_lea.vmem %s46_s18, 8192  ;;  %p3157_p6 = scmp.lt.s32.totalorder %s46_s18, %s46_s18 }
  0x2c   :  { %p3153_p5 = scmp.ne.s32.totalorder %s46_s18, %s3152_s12  ;;  %p3158_p7 = scmp.lt.s32.totalorder %s3152_s12, %s3152_s12 }
  0x2e   :  { %p3159_p8 = por %p3158_p7, %p3157_p6 }
  0x30   :  { %p3160_p9 = pnand %p3159_p8, %p3153_p5 }
  0x32   :  { %3163 = shalt.err (!%p3160_p9)
}
  0x33   :  { %s3221_s0 = smov 128   ;;  %s3222_s13 = smov 8  }
  0x34   :  { %51 = dma.hbm_to_vmem [thread:$0]  %s3405_s3, 8192, %s46_s18, [#allocation6], %s3221_s0, %s3221_s0, %s3222_s13  }
  0x35   :  { %s3223_s16 = smov [#allocation8]   ;;  %s3164_s21 = scalar_lea.hbm %s3407_s5, 2048 }
  0x36   :  { %s59_s17 = sshll.u32 %s3223_s16, 4  ;;  %p3165_p10 = scmp.ne.s32.totalorder %s3407_s5, %s3164_s21  ;;  %s60_s17 = int_to_ptr.vmem [resolvable:$true] %s59_s17 }
  0x37   :  { %p3168_p11 = scmp.lt.u32.totalorder %s3164_s21, %s3407_s5 }
  0x39   :  { %p3170_p12 = pnand %p3168_p11, %p3165_p10 }
  0x3b   :  { %3173 = shalt.err (!%p3170_p12)
}
  0x3c   :  { %s3174_s1 = scalar_lea.vmem %s60_s17, 2048  ;;  %p3179_p0 = scmp.lt.s32.totalorder %s60_s17, %s60_s17 }
  0x3d   :  { %p3175_p13 = scmp.ne.s32.totalorder %s60_s17, %s3174_s1  ;;  %p3180_p1 = scmp.lt.s32.totalorder %s3174_s1, %s3174_s1 }
  0x3f   :  { %p3181_p2 = por %p3180_p1, %p3179_p0 }
  0x41   :  { %p3182_p3 = pnand %p3181_p2, %p3175_p13 }
  0x43   :  { %3185 = shalt.err (!%p3182_p3)
}
  0x44   :  { %s3224_s3 = smov 64   ;;  %s3225_s18 = smov 4  }
  0x45   :  { %65 = dma.hbm_to_vmem [thread:$0]  %s3407_s5, 2048, %s60_s17, [#allocation9], %s3224_s3, %s3224_s3, %s3225_s18  }
  0x46   :  { %3208 = dma.done.wait [#allocation3], 224  }
  0x47   :  { %3209 = vsyncadd [#allocation3], 4294967072 }
  0x48   :  { %3210 = dma.done.wait [#allocation6], 33280  }
  0x49   :  { %3211 = vsyncadd [#allocation6], 4294934016 }
  0x4a   :  { %3212 = dma.done.wait [#allocation9], 2048  }
  0x4b   :  { %3213 = vsyncadd [#allocation9], 4294965248  ;;  %v2690_v0 = vld [vmem:[#allocation5 + $0x4] ss:$16 sps:$4 sm:$0xff]   ;;  %v2694_v2 = vld [vmem:[#allocation5] ss:$16 sps:$4 sm:$0xff]   ;;  %v89_v38 = vlaneseq }
  0x4c   :  { %v2692_v1 = vld [vmem:[#allocation5 + $0x204] ss:$16 sps:$4 sm:$0xff]   ;;  %1334 = vmatprep.subr.bf16.mxu1 %v2690_v0  ;;  %v2695_v3 = vld [vmem:[#allocation5 + $0x200] ss:$16 sps:$4 sm:$0xff]   ;;  %v3226_v36 = vmov 1983009808  }
  0x4d   :  { %1375 = vmatprep.subr.bf16.mxu0 %v2692_v1  ;;  %v2696_v4 = vld [vmem:[#allocation5 + $0x24] ss:$16 sps:$4 sm:$0xff]   ;;  %1335 = vmatpush1.bf16.msra.mxu1 %v2694_v2  ;;  %v2700_v6 = vld [vmem:[#allocation5 + $0x20] ss:$16 sps:$4 sm:$0xff]   ;;  %v87_v37 = vunpack.c.l.s4 %v3226_v36  ;;  %v3317_v43 = vshrl.u32 %v89_v38, 7  ;;  %vm1330_vm0 = vcmask 130048  }
  0x4e   :  { %1376 = vmatpush1.bf16.msra.mxu0 %v2695_v3  ;;  %v2698_v5 = vld [vmem:[#allocation5 + $0x224] ss:$16 sps:$4 sm:$0xff]   ;;  %1336 = vmatprep.subr.bf16.mxu1 %v2696_v4  ;;  %v2701_v7 = vld [vmem:[#allocation5 + $0x220] ss:$16 sps:$4 sm:$0xff]   ;;  %s3228_s8 = smov [#allocation10]  }
  0x4f   :  { %1377 = vmatprep.subr.bf16.mxu0 %v2698_v5  ;;  %v2702_v8 = vld [vmem:[#allocation5 + $0x44] ss:$16 sps:$4 sm:$0xff]   ;;  %v2706_v10 = vld [vmem:[#allocation5 + $0x40] ss:$16 sps:$4 sm:$0xff]   ;;  %v88_v42 = vunpack.c.0.s8 %v87_v37  ;;  %v2822_v37 = vld [vmem:[#allocation5 + $0xac] ss:$16 sps:$4 sm:$0xff]  }
  0x50   :  { %v2704_v9 = vld [vmem:[#allocation5 + $0x244] ss:$16 sps:$4 sm:$0xff]   ;;  %v2707_v11 = vld [vmem:[#allocation5 + $0x240] ss:$16 sps:$4 sm:$0xff]   ;;  %s2335_s9 = sshll.u32 %s3228_s8, 4  ;;  %s2336_s9 = int_to_ptr.vmem [resolvable:$true] %s2335_s9 }
  0x51   :  { %1337 = vmatpush1.bf16.msra.mxu1 %v2700_v6  ;;  %v2708_v12 = vld [vmem:[#allocation5 + $0x64] ss:$16 sps:$4 sm:$0xff]   ;;  %v2712_v14 = vld [vmem:[#allocation5 + $0x60] ss:$16 sps:$4 sm:$0xff]   ;;  %v3320_v49 = vsub.s32 %v88_v42, %v3317_v43  ;;  %v3333_v42 = vld [vmem:[#allocation2 + $0x8] sm:$0x3f]  ;;  %p3191_p5 = scmp.lt.s32.totalorder %s2336_s9, %s2336_s9 }
  0x52   :  { %1378 = vmatpush1.bf16.msra.mxu0 %v2701_v7  ;;  %1338 = vmatprep.subr.bf16.mxu1 %v2702_v8  ;;  %v2710_v13 = vld [vmem:[#allocation5 + $0x264] ss:$16 sps:$4 sm:$0xff]   ;;  %v2713_v15 = vld [vmem:[#allocation5 + $0x260] ss:$16 sps:$4 sm:$0xff]   ;;  %s3186_s10 = scalar_lea.vmem %s2336_s9, 16  ;;  %s3190_s11 = scalar_lea.vmem %s2336_s9, 32 }
  0x53   :  { %1379 = vmatprep.subr.bf16.mxu0 %v2704_v9  ;;  %v2714_v16 = vld [vmem:[#allocation5 + $0x84] ss:$16 sps:$4 sm:$0xff]   ;;  %v2718_v18 = vld [vmem:[#allocation5 + $0x80] ss:$16 sps:$4 sm:$0xff]   ;;  %p3187_p4 = scmp.ne.s32.totalorder %s2336_s9, %s3186_s10  ;;  %p3192_p6 = scmp.lt.s32.totalorder %s3190_s11, %s3186_s10 }
  0x54   :  { %v2716_v17 = vld [vmem:[#allocation5 + $0x284] ss:$16 sps:$4 sm:$0xff]   ;;  %v2719_v19 = vld [vmem:[#allocation5 + $0x280] ss:$16 sps:$4 sm:$0xff]  }
  0x55   :  { %1339 = vmatpush1.bf16.msra.mxu1 %v2706_v10  ;;  %v2720_v20 = vld [vmem:[#allocation5 + $0xa4] ss:$16 sps:$4 sm:$0xff]   ;;  %v2724_v22 = vld [vmem:[#allocation5 + $0xa0] ss:$16 sps:$4 sm:$0xff]   ;;  %p3193_p7 = por %p3192_p6, %p3191_p5 }
  0x56   :  { %1380 = vmatpush1.bf16.msra.mxu0 %v2707_v11  ;;  %1340 = vmatprep.subr.bf16.mxu1 %v2708_v12  ;;  %v2722_v21 = vld [vmem:[#allocation5 + $0x2a4] ss:$16 sps:$4 sm:$0xff]   ;;  %v2725_v23 = vld [vmem:[#allocation5 + $0x2a0] ss:$16 sps:$4 sm:$0xff]  }
  0x57   :  { %1381 = vmatprep.subr.bf16.mxu0 %v2710_v13  ;;  %v2726_v24 = vld [vmem:[#allocation5 + $0xc4] ss:$16 sps:$4 sm:$0xff]   ;;  %v2730_v26 = vld [vmem:[#allocation5 + $0xc0] ss:$16 sps:$4 sm:$0xff]   ;;  %p3194_p8 = pnand %p3193_p7, %p3187_p4 }
  0x58   :  { %v2728_v25 = vld [vmem:[#allocation5 + $0x2c4] ss:$16 sps:$4 sm:$0xff]   ;;  %v2731_v27 = vld [vmem:[#allocation5 + $0x2c0] ss:$16 sps:$4 sm:$0xff]  }
  0x59   :  { %1341 = vmatpush1.bf16.msra.mxu1 %v2712_v14  ;;  %v2732_v28 = vld [vmem:[#allocation5 + $0xe4] ss:$16 sps:$4 sm:$0xff]   ;;  %v2736_v30 = vld [vmem:[#allocation5 + $0xe0] ss:$16 sps:$4 sm:$0xff]  }
  0x5a   :  { %1382 = vmatpush1.bf16.msra.mxu0 %v2713_v15  ;;  %1342 = vmatprep.subr.bf16.mxu1 %v2714_v16  ;;  %v2734_v29 = vld [vmem:[#allocation5 + $0x2e4] ss:$16 sps:$4 sm:$0xff]   ;;  %v2737_v31 = vld [vmem:[#allocation5 + $0x2e0] ss:$16 sps:$4 sm:$0xff]   ;;  %v2792_v15 = vld [vmem:[#allocation5 + $0xc] ss:$16 sps:$4 sm:$0xff]  }
  0x5b   :  { %1383 = vmatprep.subr.bf16.mxu0 %v2716_v17  ;;  %v2738_v32 = vld [vmem:[#allocation5 + $0x104] ss:$16 sps:$4 sm:$0xff]   ;;  %v2742_v34 = vld [vmem:[#allocation5 + $0x100] ss:$16 sps:$4 sm:$0xff]  }
  0x5c   :  { %v2740_v33 = vld [vmem:[#allocation5 + $0x304] ss:$16 sps:$4 sm:$0xff]   ;;  %v2743_v35 = vld [vmem:[#allocation5 + $0x300] ss:$16 sps:$4 sm:$0xff]  }
  0x5d   :  { %1343 = vmatpush1.bf16.msra.mxu1 %v2718_v18  ;;  %v2744_v39 = vld [vmem:[#allocation5 + $0x124] ss:$16 sps:$4 sm:$0xff]   ;;  %v2748_v41 = vld [vmem:[#allocation5 + $0x120] ss:$16 sps:$4 sm:$0xff]  }
  0x5e   :  { %1384 = vmatpush1.bf16.msra.mxu0 %v2719_v19  ;;  %1344 = vmatprep.subr.bf16.mxu1 %v2720_v20  ;;  %v2746_v40 = vld [vmem:[#allocation5 + $0x324] ss:$16 sps:$4 sm:$0xff]   ;;  %v2749_v44 = vld [vmem:[#allocation5 + $0x320] ss:$16 sps:$4 sm:$0xff]   ;;  %v2790_v19 = vld [vmem:[#allocation5 + $0x8] ss:$16 sps:$4 sm:$0xff]  }
  0x5f   :  { %1385 = vmatprep.subr.bf16.mxu0 %v2722_v21  ;;  %v2750_v45 = vld [vmem:[#allocation5 + $0x144] ss:$16 sps:$4 sm:$0xff]   ;;  %v2754_v47 = vld [vmem:[#allocation5 + $0x140] ss:$16 sps:$4 sm:$0xff]   ;;  %v2798_v21 = vld [vmem:[#allocation5 + $0x2c] ss:$16 sps:$4 sm:$0xff]  }
  0x60   :  { %v2752_v46 = vld [vmem:[#allocation5 + $0x344] ss:$16 sps:$4 sm:$0xff]   ;;  %v2755_v48 = vld [vmem:[#allocation5 + $0x340] ss:$16 sps:$4 sm:$0xff]  }
  0x61   :  { %1345 = vmatpush1.bf16.msra.mxu1 %v2724_v22  ;;  %v2756_v50 = vld [vmem:[#allocation5 + $0x164] ss:$16 sps:$4 sm:$0xff]   ;;  %v2760_v53 = vld [vmem:[#allocation5 + $0x160] ss:$16 sps:$4 sm:$0xff]  }
  0x62   :  { %1386 = vmatpush1.bf16.msra.mxu0 %v2725_v23  ;;  %1346 = vmatprep.subr.bf16.mxu1 %v2726_v24  ;;  %v2758_v51 = vld [vmem:[#allocation5 + $0x364] ss:$16 sps:$4 sm:$0xff]   ;;  %v2761_v56 = vld [vmem:[#allocation5 + $0x360] ss:$16 sps:$4 sm:$0xff]   ;;  %v2796_v23 = vld [vmem:[#allocation5 + $0x28] ss:$16 sps:$4 sm:$0xff]  }
  0x63   :  { %1387 = vmatprep.subr.bf16.mxu0 %v2728_v25  ;;  %v81_v52 = vld [vmem:[#allocation2] sm:$0xff]  ;;  %v2804_v25 = vld [vmem:[#allocation5 + $0x4c] ss:$16 sps:$4 sm:$0xff]  }
  0x64   :  { %v92_v54 = vrot.slane %v81_v52, %v3320_v49  ;;  %v85_v55 = vcombine.high %v81_v52, %v81_v52  ;;  %v2762_v57 = vld [vmem:[#allocation5 + $0x184] ss:$16 sps:$4 sm:$0xff]   ;;  %v2766_v61 = vld [vmem:[#allocation5 + $0x180] ss:$16 sps:$4 sm:$0xff]  }
  0x65   :  { %1347 = vmatpush1.bf16.msra.mxu1 %v2730_v26  ;;  %v2764_v58 = vld [vmem:[#allocation5 + $0x384] ss:$16 sps:$4 sm:$0xff]   ;;  %v2767_v0 = vld [vmem:[#allocation5 + $0x380] ss:$16 sps:$4 sm:$0xff]  }
  0x66   :  { %1388 = vmatpush1.bf16.msra.mxu0 %v2731_v27  ;;  %1348 = vmatprep.subr.bf16.mxu1 %v2732_v28  ;;  %v100_v59 = vcombine.high %v92_v54, %v92_v54  ;;  %v99_v60 = vrot.slane %v85_v55, %v3320_v49  ;;  %v2768_v1 = vld [vmem:[#allocation5 + $0x1a4] ss:$16 sps:$4 sm:$0xff]   ;;  %v2772_v4 = vld [vmem:[#allocation5 + $0x1a0] ss:$16 sps:$4 sm:$0xff]   ;;  %v3327_v16 = vpack.c.bf16 %v92_v54, %v92_v54  ;;  %v2802_v27 = vld [vmem:[#allocation5 + $0x48] ss:$16 sps:$4 sm:$0xff]  }
  0x67   :  { %1389 = vmatprep.subr.bf16.mxu0 %v2734_v29  ;;  %v2770_v2 = vld [vmem:[#allocation5 + $0x3a4] ss:$16 sps:$4 sm:$0xff]   ;;  %v2773_v5 = vld [vmem:[#allocation5 + $0x3a0] ss:$16 sps:$4 sm:$0xff]   ;;  %v2810_v29 = vld [vmem:[#allocation5 + $0x6c] ss:$16 sps:$4 sm:$0xff]  }
  0x68   :  { %v126_v62 = vpack.c.bf16 %v100_v59, %v100_v59  ;;  %v101_v63 = vcombine.high %v99_v60, %v99_v60  ;;  %v2774_v6 = vld [vmem:[#allocation5 + $0x1c4] ss:$16 sps:$4 sm:$0xff]   ;;  %v2778_v8 = vld [vmem:[#allocation5 + $0x1c0] ss:$16 sps:$4 sm:$0xff]   ;;  %v3329_v18 = vpack.c.bf16 %v99_v60, %v99_v60  ;;  %v2840_v55 = vld [vmem:[#allocation5 + $0x10c] ss:$16 sps:$4 sm:$0xff]  }
  0x69   :  { %1349 = vmatpush1.bf16.msra.mxu1 %v2736_v30  ;;  %v2776_v7 = vld [vmem:[#allocation5 + $0x3c4] ss:$16 sps:$4 sm:$0xff]   ;;  %v2779_v9 = vld [vmem:[#allocation5 + $0x3c0] ss:$16 sps:$4 sm:$0xff]   ;;  %v2846_v59 = vld [vmem:[#allocation5 + $0x12c] ss:$16 sps:$4 sm:$0xff]  }
  0x6a   :  { %1390 = vmatpush1.bf16.msra.mxu0 %v2737_v31  ;;  %1350 = vmatprep.subr.bf16.mxu1 %v2738_v32  ;;  %v3324_v3 = vpack.c.bf16 %v101_v63, %v101_v63  ;;  %v2780_v10 = vld [vmem:[#allocation5 + $0x1e4] ss:$16 sps:$4 sm:$0xff]   ;;  %v2784_v12 = vld [vmem:[#allocation5 + $0x1e0] ss:$16 sps:$4 sm:$0xff]   ;;  %v2808_v31 = vld [vmem:[#allocation5 + $0x68] ss:$16 sps:$4 sm:$0xff]  }
  0x6b   :  { %1391 = vmatprep.subr.bf16.mxu0 %v2740_v33  ;;  %1366 = vmatprep.mubr.bf16.mxu1 %v126_v62  ;;  %v2782_v11 = vld [vmem:[#allocation5 + $0x3e4] ss:$16 sps:$4 sm:$0xff]   ;;  %v2785_v13 = vld [vmem:[#allocation5 + $0x3e0] ss:$16 sps:$4 sm:$0xff]   ;;  %v2816_v33 = vld [vmem:[#allocation5 + $0x8c] ss:$16 sps:$4 sm:$0xff]  }
  0x6c   :  { %1407 = vmatprep.mubr.bf16.mxu0 %v3324_v3  ;;  %v2789_v14 = vld [vmem:[#allocation5 + $0x404] ss:$16 sps:$4 sm:$0xff]   ;;  %v2787_v17 = vld [vmem:[#allocation5 + $0x400] ss:$16 sps:$4 sm:$0xff]   ;;  %v2852_v63 = vld [vmem:[#allocation5 + $0x14c] ss:$16 sps:$4 sm:$0xff]  }
  0x6d   :  { %1351 = vmatpush1.bf16.msra.mxu1 %v2742_v34  ;;  %v2795_v20 = vld [vmem:[#allocation5 + $0x424] ss:$16 sps:$4 sm:$0xff]   ;;  %v2793_v22 = vld [vmem:[#allocation5 + $0x420] ss:$16 sps:$4 sm:$0xff]  }
  0x6e   :  { %1392 = vmatpush1.bf16.msra.mxu0 %v2743_v35  ;;  %1352 = vmatprep.subr.bf16.mxu1 %v2744_v39  ;;  %v2801_v24 = vld [vmem:[#allocation5 + $0x444] ss:$16 sps:$4 sm:$0xff]   ;;  %v2799_v26 = vld [vmem:[#allocation5 + $0x440] ss:$16 sps:$4 sm:$0xff]   ;;  %v2814_v35 = vld [vmem:[#allocation5 + $0x88] ss:$16 sps:$4 sm:$0xff]  }
  0x6f   :  { %1393 = vmatprep.subr.bf16.mxu0 %v2746_v40  ;;  %v2807_v28 = vld [vmem:[#allocation5 + $0x464] ss:$16 sps:$4 sm:$0xff]   ;;  %v2805_v30 = vld [vmem:[#allocation5 + $0x460] ss:$16 sps:$4 sm:$0xff]   ;;  %v2820_v39 = vld [vmem:[#allocation5 + $0xa8] ss:$16 sps:$4 sm:$0xff]  }
  0x70   :  { %v2813_v32 = vld [vmem:[#allocation5 + $0x484] ss:$16 sps:$4 sm:$0xff]   ;;  %v2811_v34 = vld [vmem:[#allocation5 + $0x480] ss:$16 sps:$4 sm:$0xff]  }
  0x71   :  { %1353 = vmatpush1.bf16.msra.mxu1 %v2748_v41  ;;  %v2819_v36 = vld [vmem:[#allocation5 + $0x4a4] ss:$16 sps:$4 sm:$0xff]   ;;  %v2817_v38 = vld [vmem:[#allocation5 + $0x4a0] ss:$16 sps:$4 sm:$0xff]   ;;  %v2828_v41 = vld [vmem:[#allocation5 + $0xcc] ss:$16 sps:$4 sm:$0xff]  }
  0x72   :  { %1394 = vmatpush1.bf16.msra.mxu0 %v2749_v44  ;;  %1354 = vmatprep.subr.bf16.mxu1 %v2750_v45  ;;  %v2825_v40 = vld [vmem:[#allocation5 + $0x4c4] ss:$16 sps:$4 sm:$0xff]   ;;  %v3337_v44 = vrot.slane %v3333_v42, %v3320_v49  ;;  %v2823_v45 = vld [vmem:[#allocation5 + $0x4c0] ss:$16 sps:$4 sm:$0xff]  }
  0x73   :  { %1395 = vmatprep.subr.bf16.mxu0 %v2752_v46  ;;  %v2826_v46 = vld [vmem:[#allocation5 + $0xc8] ss:$16 sps:$4 sm:$0xff]   ;;  %v2829_v52 = vld [vmem:[#allocation5 + $0x4e0] ss:$16 sps:$4 sm:$0xff]   ;;  %v2837_v54 = vld [vmem:[#allocation5 + $0x504] ss:$16 sps:$4 sm:$0xff]  }
  0x74   :  { %v2841_v60 = vld [vmem:[#allocation5 + $0x520] ss:$16 sps:$4 sm:$0xff]  }
  0x75   :  { %1355 = vmatpush1.bf16.msra.mxu1 %v2754_v47  ;;  %v117_v47 = vcombine.high %v3337_v44, %v3337_v44 }
  0x76   :  { %1396 = vmatpush1.bf16.msra.mxu0 %v2755_v48  ;;  %1356 = vmatprep.subr.bf16.mxu1 %v2756_v50  ;;  %v2831_v48 = vld [vmem:[#allocation5 + $0x4e4] ss:$16 sps:$4 sm:$0xff]   ;;  %v2834_v50 = vld [vmem:[#allocation5 + $0xec] ss:$16 sps:$4 sm:$0xff]  }
  0x77   :  { %1397 = vmatprep.subr.bf16.mxu0 %v2758_v51  ;;  %v3341_v51 = vpack.c.bf16 %v117_v47, %v117_v47  ;;  %v2986_v47 = vld [vmem:[#allocation7] ss:$8 sps:$4 sm:$0xff]  }
  0x79   :  { %1357 = vmatpush1.bf16.msra.mxu1 %v2760_v53  ;;  %v2832_v53 = vld [vmem:[#allocation5 + $0xe8] ss:$16 sps:$4 sm:$0xff]  }
  0x7a   :  { %1398 = vmatpush1.bf16.msra.mxu0 %v2761_v56  ;;  %1358 = vmatprep.subr.bf16.mxu1 %v2762_v57  ;;  %v2835_v56 = vld [vmem:[#allocation5 + $0x500] ss:$16 sps:$4 sm:$0xff]   ;;  %v2838_v57 = vld [vmem:[#allocation5 + $0x108] ss:$16 sps:$4 sm:$0xff]  }
  0x7b   :  { %1399 = vmatprep.subr.bf16.mxu0 %v2764_v58  ;;  %v2843_v58 = vld [vmem:[#allocation5 + $0x524] ss:$16 sps:$4 sm:$0xff]  }
  0x7d   :  { %1359 = vmatpush1.bf16.msra.mxu1 %v2766_v61  ;;  %v2844_v61 = vld [vmem:[#allocation5 + $0x128] ss:$16 sps:$4 sm:$0xff]  }
  0x7e   :  { %1400 = vmatpush1.bf16.msra.mxu0 %v2767_v0  ;;  %1360 = vmatprep.subr.bf16.mxu1 %v2768_v1  ;;  %v2847_v0 = vld [vmem:[#allocation5 + $0x540] ss:$16 sps:$4 sm:$0xff]   ;;  %v2850_v1 = vld [vmem:[#allocation5 + $0x148] ss:$16 sps:$4 sm:$0xff]  }
  0x7f   :  { %1401 = vmatprep.subr.bf16.mxu0 %v2770_v2  ;;  %v2855_v2 = vld [vmem:[#allocation5 + $0x564] ss:$16 sps:$4 sm:$0xff]  }
  0x81   :  { %1361 = vmatpush1.bf16.msra.mxu1 %v2772_v4  ;;  %v2858_v4 = vld [vmem:[#allocation5 + $0x16c] ss:$16 sps:$4 sm:$0xff]  }
  0x82   :  { %1402 = vmatpush1.bf16.msra.mxu0 %v2773_v5  ;;  %1362 = vmatprep.subr.bf16.mxu1 %v2774_v6  ;;  %v2853_v5 = vld [vmem:[#allocation5 + $0x560] ss:$16 sps:$4 sm:$0xff]   ;;  %v2856_v6 = vld [vmem:[#allocation5 + $0x168] ss:$16 sps:$4 sm:$0xff]  }
  0x83   :  { %1403 = vmatprep.subr.bf16.mxu0 %v2776_v7  ;;  %v2861_v7 = vld [vmem:[#allocation5 + $0x584] ss:$16 sps:$4 sm:$0xff]  }
  0x85   :  { %1363 = vmatpush1.bf16.msra.mxu1 %v2778_v8  ;;  %v2864_v8 = vld [vmem:[#allocation5 + $0x18c] ss:$16 sps:$4 sm:$0xff]  }
  0x86   :  { %1404 = vmatpush1.bf16.msra.mxu0 %v2779_v9  ;;  %1364 = vmatprep.subr.bf16.mxu1 %v2780_v10  ;;  %v2859_v9 = vld [vmem:[#allocation5 + $0x580] ss:$16 sps:$4 sm:$0xff]   ;;  %v2862_v10 = vld [vmem:[#allocation5 + $0x188] ss:$16 sps:$4 sm:$0xff]  }
  0x87   :  { %1405 = vmatprep.subr.bf16.mxu0 %v2782_v11  ;;  %v2867_v11 = vld [vmem:[#allocation5 + $0x5a4] ss:$16 sps:$4 sm:$0xff]  }
  0x89   :  { %1365 = vmatpush1.bf16.msra.mxu1 %v2784_v12  ;;  %v2870_v12 = vld [vmem:[#allocation5 + $0x1ac] ss:$16 sps:$4 sm:$0xff]  }
  0x8a   :  { %1406 = vmatpush1.bf16.msra.mxu0 %v2785_v13  ;;  %1498 = vmatprep.subr.bf16.mxu1 %v2792_v15  ;;  %v2865_v13 = vld [vmem:[#allocation5 + $0x5a0] ss:$16 sps:$4 sm:$0xff]   ;;  %v2873_v15 = vld [vmem:[#allocation5 + $0x5c4] ss:$16 sps:$4 sm:$0xff]  }
  0x8b   :  { %1416 = vmatprep.subr.bf16.mxu0 %v2789_v14  ;;  %v2868_v14 = vld [vmem:[#allocation5 + $0x1a8] ss:$16 sps:$4 sm:$0xff]  }
  0x8c   :  { %1367 = vmatmul.mubr.bf16.vlgmr.msra.gmra.mrb[0].mxu1 %v3327_v16 }
  0x8d   :  { %1408 = vmatmul.mubr.bf16.vlgmr.msra.gmra.mrb[0].mxu0 %v3329_v18  ;;  %1499 = vmatpush1.bf16.msra.mxu1 %v2790_v19  ;;  %v2871_v19 = vld [vmem:[#allocation5 + $0x5c0] ss:$16 sps:$4 sm:$0xff]  }
  0x8e   :  { %1417 = vmatpush1.bf16.msra.mxu0 %v2787_v17  ;;  %1500 = vmatprep.subr.bf16.mxu1 %v2798_v21  ;;  %v2876_v17 = vld [vmem:[#allocation5 + $0x1cc] ss:$16 sps:$4 sm:$0xff]   ;;  %v2879_v21 = vld [vmem:[#allocation5 + $0x5e4] ss:$16 sps:$4 sm:$0xff]  }
  0x8f   :  { %1418 = vmatprep.subr.bf16.mxu0 %v2795_v20  ;;  %1530 = vmatprep.mubr.bf16.mxu1 %v126_v62  ;;  %v2849_v62 = vld [vmem:[#allocation5 + $0x544] ss:$16 sps:$4 sm:$0xff]   ;;  %v2874_v20 = vld [vmem:[#allocation5 + $0x1c8] ss:$16 sps:$4 sm:$0xff]  }
  0x90   :  { %1448 = vmatprep.mubr.bf16.mxu0 %v3341_v51 }
  0x91   :  { %1501 = vmatpush1.bf16.msra.mxu1 %v2796_v23  ;;  %v2877_v23 = vld [vmem:[#allocation5 + $0x5e0] ss:$16 sps:$4 sm:$0xff]  }
  0x92   :  { %1419 = vmatpush1.bf16.msra.mxu0 %v2793_v22  ;;  %1502 = vmatprep.subr.bf16.mxu1 %v2804_v25  ;;  %v2882_v22 = vld [vmem:[#allocation5 + $0x1ec] ss:$16 sps:$4 sm:$0xff]  }
  0x93   :  { %1420 = vmatprep.subr.bf16.mxu0 %v2801_v24  ;;  %v2880_v24 = vld [vmem:[#allocation5 + $0x1e8] ss:$16 sps:$4 sm:$0xff]   ;;  %v2886_v25 = vld [vmem:[#allocation5 + $0x20c] ss:$16 sps:$4 sm:$0xff]  }
  0x95   :  { %1503 = vmatpush1.bf16.msra.mxu1 %v2802_v27  ;;  %v3346_v27 = vpack.c.bf16 %v3337_v44, %v3337_v44  ;;  %v2904_v44 = vld [vmem:[#allocation5 + $0x2ac] ss:$16 sps:$4 sm:$0xff]  }
  0x96   :  { %1421 = vmatpush1.bf16.msra.mxu0 %v2799_v26  ;;  %1504 = vmatprep.subr.bf16.mxu1 %v2810_v29  ;;  %v2892_v26 = vld [vmem:[#allocation5 + $0x604] ss:$16 sps:$4 sm:$0xff]   ;;  %v2890_v29 = vld [vmem:[#allocation5 + $0x600] ss:$16 sps:$4 sm:$0xff]  }
  0x97   :  { %1422 = vmatprep.subr.bf16.mxu0 %v2807_v28  ;;  %v2884_v28 = vld [vmem:[#allocation5 + $0x208] ss:$16 sps:$4 sm:$0xff]  }
  0x99   :  { %1505 = vmatpush1.bf16.msra.mxu1 %v2808_v31  ;;  %v2982_v31 = vld [vmem:[#allocation5 + $0x60c] ss:$16 sps:$4 sm:$0xff]  }
  0x9a   :  { %1423 = vmatpush1.bf16.msra.mxu0 %v2805_v30  ;;  %1506 = vmatprep.subr.bf16.mxu1 %v2816_v33  ;;  %v2889_v30 = vld [vmem:[#allocation5 + $0x22c] ss:$16 sps:$4 sm:$0xff]   ;;  %v2887_v33 = vld [vmem:[#allocation5 + $0x228] ss:$16 sps:$4 sm:$0xff]  }
  0x9b   :  { %1424 = vmatprep.subr.bf16.mxu0 %v2813_v32  ;;  %v102_v32 = vcombine.high %v3333_v42, %v3333_v42  ;;  %v2899_v42 = vld [vmem:[#allocation5 + $0x288] ss:$16 sps:$4 sm:$0xff]  }
  0x9d   :  { %1507 = vmatpush1.bf16.msra.mxu1 %v2814_v35  ;;  %v3227_v35 = vmov 0  }
  0x9e   :  { %1425 = vmatpush1.bf16.msra.mxu0 %v2811_v34  ;;  %1508 = vmatprep.subr.bf16.mxu1 %v2822_v37  ;;  %v2895_v34 = vld [vmem:[#allocation5 + $0x24c] ss:$16 sps:$4 sm:$0xff]   ;;  %v116_v37 = vrot.slane %v102_v32, %v3320_v49  ;;  %v2905_v49 = vld [vmem:[#allocation5 + $0x2c8] ss:$16 sps:$4 sm:$0xff]  }
  0x9f   :  { %1426 = vmatprep.subr.bf16.mxu0 %v2819_v36  ;;  %v2893_v36 = vld [vmem:[#allocation5 + $0x248] ss:$16 sps:$4 sm:$0xff]  }
  0xa0   :  { %v2938_v32 = vld [vmem:[#allocation5 + $0x428] ss:$16 sps:$4 sm:$0xff]  }
  0xa1   :  { %1509 = vmatpush1.bf16.msra.mxu1 %v2820_v39  ;;  %v2896_v39 = vld [vmem:[#allocation5 + $0x268] ss:$16 sps:$4 sm:$0xff]  }
  0xa2   :  { %1427 = vmatpush1.bf16.msra.mxu0 %v2817_v38  ;;  %1510 = vmatprep.subr.bf16.mxu1 %v2828_v41  ;;  %v2898_v38 = vld [vmem:[#allocation5 + $0x26c] ss:$16 sps:$4 sm:$0xff]   ;;  %v131_v41 = vpack.c.bf16 %v116_v37, %v116_v37 }
  0xa3   :  { %1428 = vmatprep.subr.bf16.mxu0 %v2825_v40  ;;  %v2980_v40 = vld [vmem:[#allocation5 + $0x608] ss:$16 sps:$4 sm:$0xff]   ;;  %v2946_v37 = vld [vmem:[#allocation5 + $0x46c] ss:$16 sps:$4 sm:$0xff]  }
  0xa5   :  { %1511 = vmatpush1.bf16.msra.mxu1 %v2826_v46  ;;  %v2910_v46 = vld [vmem:[#allocation5 + $0x2ec] ss:$16 sps:$4 sm:$0xff]  }
  0xa6   :  { %1429 = vmatpush1.bf16.msra.mxu0 %v2823_v45  ;;  %1512 = vmatprep.subr.bf16.mxu1 %v2834_v50  ;;  %v2907_v45 = vld [vmem:[#allocation5 + $0x2cc] ss:$16 sps:$4 sm:$0xff]  }
  0xa7   :  { %1430 = vmatprep.subr.bf16.mxu0 %v2831_v48  ;;  %v2988_v48 = vld [vmem:[#allocation7 + $0x4] ss:$8 sps:$4 sm:$0xff]   ;;  %v2991_v50 = vld [vmem:[#allocation7 + $0x14] ss:$8 sps:$4 sm:$0xff]  }
  0xa9   :  { %1513 = vmatpush1.bf16.msra.mxu1 %v2832_v53  ;;  %v2989_v53 = vld [vmem:[#allocation7 + $0x10] ss:$8 sps:$4 sm:$0xff]  }
  0xaa   :  { %1431 = vmatpush1.bf16.msra.mxu0 %v2829_v52  ;;  %1514 = vmatprep.subr.bf16.mxu1 %v2840_v55  ;;  %v2908_v52 = vld [vmem:[#allocation5 + $0x2e8] ss:$16 sps:$4 sm:$0xff]   ;;  %v2994_v55 = vld [vmem:[#allocation7 + $0x24] ss:$8 sps:$4 sm:$0xff]  }
  0xab   :  { %1432 = vmatprep.subr.bf16.mxu0 %v2837_v54  ;;  %v2913_v54 = vld [vmem:[#allocation5 + $0x30c] ss:$16 sps:$4 sm:$0xff]  }
  0xad   :  { %1515 = vmatpush1.bf16.msra.mxu1 %v2838_v57  ;;  %v2992_v57 = vld [vmem:[#allocation7 + $0x20] ss:$8 sps:$4 sm:$0xff]  }
  0xae   :  { %1433 = vmatpush1.bf16.msra.mxu0 %v2835_v56  ;;  %1516 = vmatprep.subr.bf16.mxu1 %v2846_v59  ;;  %v2911_v56 = vld [vmem:[#allocation5 + $0x308] ss:$16 sps:$4 sm:$0xff]   ;;  %v2997_v59 = vld [vmem:[#allocation7 + $0x34] ss:$8 sps:$4 sm:$0xff]  }
  0xaf   :  { %1434 = vmatprep.subr.bf16.mxu0 %v2843_v58  ;;  %v2916_v58 = vld [vmem:[#allocation5 + $0x32c] ss:$16 sps:$4 sm:$0xff]  }
  0xb1   :  { %1517 = vmatpush1.bf16.msra.mxu1 %v2844_v61  ;;  %v2995_v61 = vld [vmem:[#allocation7 + $0x30] ss:$8 sps:$4 sm:$0xff]  }
  0xb2   :  { %1435 = vmatpush1.bf16.msra.mxu0 %v2841_v60  ;;  %1518 = vmatprep.subr.bf16.mxu1 %v2852_v63  ;;  %v2914_v60 = vld [vmem:[#allocation5 + $0x328] ss:$16 sps:$4 sm:$0xff]   ;;  %v3000_v63 = vld [vmem:[#allocation7 + $0x44] ss:$8 sps:$4 sm:$0xff]  }
  0xb3   :  { %1436 = vmatprep.subr.bf16.mxu0 %v2849_v62  ;;  %v2919_v62 = vld [vmem:[#allocation5 + $0x34c] ss:$16 sps:$4 sm:$0xff]  }
  0xb5   :  { %1519 = vmatpush1.bf16.msra.mxu1 %v2850_v1  ;;  %v2998_v1 = vld [vmem:[#allocation7 + $0x40] ss:$8 sps:$4 sm:$0xff]  }
  0xb6   :  { %1437 = vmatpush1.bf16.msra.mxu0 %v2847_v0  ;;  %1520 = vmatprep.subr.bf16.mxu1 %v2858_v4  ;;  %v2917_v0 = vld [vmem:[#allocation5 + $0x348] ss:$16 sps:$4 sm:$0xff]   ;;  %v3003_v4 = vld [vmem:[#allocation7 + $0x54] ss:$8 sps:$4 sm:$0xff]  }
  0xb7   :  { %1438 = vmatprep.subr.bf16.mxu0 %v2855_v2  ;;  %v2922_v2 = vld [vmem:[#allocation5 + $0x36c] ss:$16 sps:$4 sm:$0xff]  }
  0xb9   :  { %1521 = vmatpush1.bf16.msra.mxu1 %v2856_v6  ;;  %v3001_v6 = vld [vmem:[#allocation7 + $0x50] ss:$8 sps:$4 sm:$0xff]  }
  0xba   :  { %1439 = vmatpush1.bf16.msra.mxu0 %v2853_v5  ;;  %1522 = vmatprep.subr.bf16.mxu1 %v2864_v8  ;;  %v2920_v5 = vld [vmem:[#allocation5 + $0x368] ss:$16 sps:$4 sm:$0xff]   ;;  %v3006_v8 = vld [vmem:[#allocation7 + $0x64] ss:$8 sps:$4 sm:$0xff]  }
  0xbb   :  { %1440 = vmatprep.subr.bf16.mxu0 %v2861_v7  ;;  %v2925_v7 = vld [vmem:[#allocation5 + $0x38c] ss:$16 sps:$4 sm:$0xff]  }
  0xbd   :  { %1523 = vmatpush1.bf16.msra.mxu1 %v2862_v10  ;;  %v3004_v10 = vld [vmem:[#allocation7 + $0x60] ss:$8 sps:$4 sm:$0xff]  }
  0xbe   :  { %1441 = vmatpush1.bf16.msra.mxu0 %v2859_v9  ;;  %1524 = vmatprep.subr.bf16.mxu1 %v2870_v12  ;;  %v2923_v9 = vld [vmem:[#allocation5 + $0x388] ss:$16 sps:$4 sm:$0xff]   ;;  %v3009_v12 = vld [vmem:[#allocation7 + $0x74] ss:$8 sps:$4 sm:$0xff]  }
  0xbf   :  { %1442 = vmatprep.subr.bf16.mxu0 %v2867_v11  ;;  %v2928_v11 = vld [vmem:[#allocation5 + $0x3ac] ss:$16 sps:$4 sm:$0xff]  }
  0xc1   :  { %1525 = vmatpush1.bf16.msra.mxu1 %v2868_v14  ;;  %v3007_v14 = vld [vmem:[#allocation7 + $0x70] ss:$8 sps:$4 sm:$0xff]  }
  0xc2   :  { %1443 = vmatpush1.bf16.msra.mxu0 %v2865_v13  ;;  %1526 = vmatprep.subr.bf16.mxu1 %v2876_v17  ;;  %v2926_v13 = vld [vmem:[#allocation5 + $0x3a8] ss:$16 sps:$4 sm:$0xff]   ;;  %v3012_v17 = vld [vmem:[#allocation7 + $0x84] ss:$8 sps:$4 sm:$0xff]  }
  0xc3   :  { %1444 = vmatprep.subr.bf16.mxu0 %v2873_v15  ;;  %v2931_v15 = vld [vmem:[#allocation5 + $0x3cc] ss:$16 sps:$4 sm:$0xff]  }
  0xc5   :  { %1527 = vmatpush1.bf16.msra.mxu1 %v2874_v20  ;;  %v3010_v20 = vld [vmem:[#allocation7 + $0x80] ss:$8 sps:$4 sm:$0xff]  }
  0xc6   :  { %1445 = vmatpush1.bf16.msra.mxu0 %v2871_v19  ;;  %1528 = vmatprep.subr.bf16.mxu1 %v2882_v22  ;;  %v2929_v19 = vld [vmem:[#allocation5 + $0x3c8] ss:$16 sps:$4 sm:$0xff]   ;;  %v3015_v22 = vld [vmem:[#allocation7 + $0x94] ss:$8 sps:$4 sm:$0xff]  }
  0xc7   :  { %1446 = vmatprep.subr.bf16.mxu0 %v2879_v21  ;;  %v2934_v21 = vld [vmem:[#allocation5 + $0x3ec] ss:$16 sps:$4 sm:$0xff]  }
  0xc9   :  { %1529 = vmatpush1.bf16.msra.mxu1 %v2880_v24  ;;  %v3013_v24 = vld [vmem:[#allocation7 + $0x90] ss:$8 sps:$4 sm:$0xff]  }
  0xca   :  { %1447 = vmatpush1.bf16.msra.mxu0 %v2877_v23  ;;  %1539 = vmatprep.subr.bf16.mxu1 %v2886_v25  ;;  %v2932_v23 = vld [vmem:[#allocation5 + $0x3e8] ss:$16 sps:$4 sm:$0xff]   ;;  %v2937_v25 = vld [vmem:[#allocation5 + $0x40c] ss:$16 sps:$4 sm:$0xff]  }
  0xcb   :  { %1457 = vmatprep.subr.bf16.mxu0 %v2892_v26  ;;  %v3018_v26 = vld [vmem:[#allocation7 + $0xa4] ss:$8 sps:$4 sm:$0xff]  }
  0xcc   :  { %1531 = vmatmul.mubr.bf16.vlgmr.msra.gmra.mrb[4].mxu1 %v3327_v16  ;;  %v2901_v16 = vld [vmem:[#allocation5 + $0x28c] ss:$16 sps:$4 sm:$0xff]  }
  0xcd   :  { %1449 = vmatmul.mubr.bf16.vlgmr.msra.gmra.mrb[0].mxu0 %v3346_v27  ;;  %1540 = vmatpush1.bf16.msra.mxu1 %v2884_v28  ;;  %v2935_v28 = vld [vmem:[#allocation5 + $0x408] ss:$16 sps:$4 sm:$0xff]  }
  0xce   :  { %1458 = vmatpush1.bf16.msra.mxu0 %v2890_v29  ;;  %1541 = vmatprep.subr.bf16.mxu1 %v2889_v30  ;;  %v2940_v29 = vld [vmem:[#allocation5 + $0x42c] ss:$16 sps:$4 sm:$0xff]   ;;  %v3016_v30 = vld [vmem:[#allocation7 + $0xa0] ss:$8 sps:$4 sm:$0xff]  }
  0xcf   :  { %1489 = vmatprep.mubr.bf16.mxu0 %v3227_v35  ;;  %1571 = vmatprep.mubr.bf16.mxu1 %v3324_v3  ;;  %v2902_v3 = vld [vmem:[#allocation5 + $0x2a8] ss:$16 sps:$4 sm:$0xff]  }
  0xd0   :  { %1621 = vmatprep.subr.bf16.mxu0 %v2982_v31  ;;  %v3021_v31 = vld [vmem:[#allocation7 + $0xb4] ss:$8 sps:$4 sm:$0xff]  }
  0xd1   :  { %1542 = vmatpush1.bf16.msra.mxu1 %v2887_v33  ;;  %v2943_v33 = vld [vmem:[#allocation5 + $0x44c] ss:$16 sps:$4 sm:$0xff]  }
  0xd2   :  { %1543 = vmatprep.subr.bf16.mxu1 %v2895_v34  ;;  %v3019_v34 = vld [vmem:[#allocation7 + $0xb0] ss:$8 sps:$4 sm:$0xff]  }
  0xd5   :  { %1544 = vmatpush1.bf16.msra.mxu1 %v2893_v36  ;;  %v2941_v36 = vld [vmem:[#allocation5 + $0x448] ss:$16 sps:$4 sm:$0xff]  }
  0xd6   :  { %1545 = vmatprep.subr.bf16.mxu1 %v2898_v38  ;;  %v3022_v38 = vld [vmem:[#allocation7 + $0xc0] ss:$8 sps:$4 sm:$0xff]  }
  0xd9   :  { %2542 = vmatmul.mubr.msk.bf16.vlgmr.msra.gmra.mrb[0].mxu0 %vm1330_vm0, %v131_v41  ;;  %1546 = vmatpush1.bf16.msra.mxu1 %v2896_v39  ;;  %v3027_v39 = vld [vmem:[#allocation7 + $0xd4] ss:$8 sps:$4 sm:$0xff]  }
  0xda   :  { %1622 = vmatpush1.bf16.msra.mxu0 %v2980_v40  ;;  %1547 = vmatprep.subr.bf16.mxu1 %v2901_v16  ;;  %v2949_v40 = vld [vmem:[#allocation5 + $0x48c] ss:$16 sps:$4 sm:$0xff]  }
  0xdb   :  { %1653 = vmatprep.mubr.bf16.mxu0 %v3227_v35  ;;  %2066 = vmatprep.subr.bf16.mxu0 %v2988_v48  ;;  %v3024_v35 = vld [vmem:[#allocation7 + $0xc4] ss:$8 sps:$4 sm:$0xff]  }
  0xdc   :  { %v2952_v16 = vld [vmem:[#allocation5 + $0x4ac] ss:$16 sps:$4 sm:$0xff]  }
  0xdd   :  { %1548 = vmatpush1.bf16.msra.mxu1 %v2899_v42  ;;  %v2950_v42 = vld [vmem:[#allocation5 + $0x4a8] ss:$16 sps:$4 sm:$0xff]   ;;  %v2964_v48 = vld [vmem:[#allocation5 + $0x52c] ss:$16 sps:$4 sm:$0xff]  }
  0xde   :  { %1549 = vmatprep.subr.bf16.mxu1 %v2904_v44  ;;  %v2955_v44 = vld [vmem:[#allocation5 + $0x4cc] ss:$16 sps:$4 sm:$0xff]  }
  0xe1   :  { %2543 = vmatmul.mubr.msk.bf16.vlgmr.msra.gmra.mrb[4].mxu0 %vm1330_vm0, %v131_v41  ;;  %1550 = vmatpush1.bf16.msra.mxu1 %v2902_v3  ;;  %v2947_v41 = vld [vmem:[#allocation5 + $0x488] ss:$16 sps:$4 sm:$0xff]  }
  0xe2   :  { %1551 = vmatprep.subr.bf16.mxu1 %v2907_v45  ;;  %2067 = vmatpush1.bf16.msra.mxu0 %v2986_v47  ;;  %v2953_v3 = vld [vmem:[#allocation5 + $0x4c8] ss:$16 sps:$4 sm:$0xff]   ;;  %v2958_v45 = vld [vmem:[#allocation5 + $0x4ec] ss:$16 sps:$4 sm:$0xff]  }
  0xe3   :  { %2068 = vmatprep.subr.bf16.mxu0 %v2991_v50  ;;  %v2959_v47 = vld [vmem:[#allocation5 + $0x508] ss:$16 sps:$4 sm:$0xff]   ;;  %v3030_v50 = vld [vmem:[#allocation7 + $0xe4] ss:$8 sps:$4 sm:$0xff]  }
  0xe5   :  { %1552 = vmatpush1.bf16.msra.mxu1 %v2905_v49  ;;  %v2956_v49 = vld [vmem:[#allocation5 + $0x4e8] ss:$16 sps:$4 sm:$0xff]  }
  0xe6   :  { %1553 = vmatprep.subr.bf16.mxu1 %v2910_v46  ;;  %2069 = vmatpush1.bf16.msra.mxu0 %v2989_v53  ;;  %v2961_v46 = vld [vmem:[#allocation5 + $0x50c] ss:$16 sps:$4 sm:$0xff]   ;;  %v2962_v53 = vld [vmem:[#allocation5 + $0x528] ss:$16 sps:$4 sm:$0xff]  }
  0xe7   :  { %2070 = vmatprep.subr.bf16.mxu0 %v2994_v55  ;;  %v3033_v55 = vld [vmem:[#allocation7 + $0xf4] ss:$8 sps:$4 sm:$0xff]  }
  0xe9   :  { %1554 = vmatpush1.bf16.msra.mxu1 %v2908_v52  ;;  %v3028_v52 = vld [vmem:[#allocation7 + $0xe0] ss:$8 sps:$4 sm:$0xff]  }
  0xea   :  { %1555 = vmatprep.subr.bf16.mxu1 %v2913_v54  ;;  %2071 = vmatpush1.bf16.msra.mxu0 %v2992_v57  ;;  %v2967_v54 = vld [vmem:[#allocation5 + $0x54c] ss:$16 sps:$4 sm:$0xff]   ;;  %v2965_v57 = vld [vmem:[#allocation5 + $0x548] ss:$16 sps:$4 sm:$0xff]  }
  0xeb   :  { %2072 = vmatprep.subr.bf16.mxu0 %v2997_v59  ;;  %v3036_v59 = vld [vmem:[#allocation7 + $0x104] ss:$8 sps:$4 sm:$0xff]  }
  0xed   :  { %1556 = vmatpush1.bf16.msra.mxu1 %v2911_v56  ;;  %v3031_v56 = vld [vmem:[#allocation7 + $0xf0] ss:$8 sps:$4 sm:$0xff]  }
  0xee   :  { %1557 = vmatprep.subr.bf16.mxu1 %v2916_v58  ;;  %2073 = vmatpush1.bf16.msra.mxu0 %v2995_v61  ;;  %v2970_v58 = vld [vmem:[#allocation5 + $0x56c] ss:$16 sps:$4 sm:$0xff]  }
  0xef   :  { %2074 = vmatprep.subr.bf16.mxu0 %v3000_v63  ;;  %v2973_v61 = vld [vmem:[#allocation5 + $0x58c] ss:$16 sps:$4 sm:$0xff]  }
  0xf0   :  { %v2976_v63 = vld [vmem:[#allocation5 + $0x5ac] ss:$16 sps:$4 sm:$0xff]  }
  0xf1   :  { %1558 = vmatpush1.bf16.msra.mxu1 %v2914_v60  ;;  %v2968_v60 = vld [vmem:[#allocation5 + $0x568] ss:$16 sps:$4 sm:$0xff]  }
  0xf2   :  { %1559 = vmatprep.subr.bf16.mxu1 %v2919_v62  ;;  %2075 = vmatpush1.bf16.msra.mxu0 %v2998_v1  ;;  %v2971_v62 = vld [vmem:[#allocation5 + $0x588] ss:$16 sps:$4 sm:$0xff]   ;;  %v2979_v1 = vld [vmem:[#allocation5 + $0x5cc] ss:$16 sps:$4 sm:$0xff]  }
  0xf3   :  { %2076 = vmatprep.subr.bf16.mxu0 %v3003_v4  ;;  %v2985_v4 = vld [vmem:[#allocation5 + $0x5ec] ss:$16 sps:$4 sm:$0xff]  }
  0xf5   :  { %1560 = vmatpush1.bf16.msra.mxu1 %v2917_v0  ;;  %v2974_v0 = vld [vmem:[#allocation5 + $0x5a8] ss:$16 sps:$4 sm:$0xff]  }
  0xf6   :  { %1561 = vmatprep.subr.bf16.mxu1 %v2922_v2  ;;  %2077 = vmatpush1.bf16.msra.mxu0 %v3001_v6  ;;  %v2977_v2 = vld [vmem:[#allocation5 + $0x5c8] ss:$16 sps:$4 sm:$0xff]  }
  0xf7   :  { %2078 = vmatprep.subr.bf16.mxu0 %v3006_v8 }
  0xf9   :  { %1562 = vmatpush1.bf16.msra.mxu1 %v2920_v5  ;;  %v2983_v5 = vld [vmem:[#allocation5 + $0x5e8] ss:$16 sps:$4 sm:$0xff]  }
  0xfa   :  { %1563 = vmatprep.subr.bf16.mxu1 %v2925_v7  ;;  %2079 = vmatpush1.bf16.msra.mxu0 %v3004_v10  ;;  %v332_v10 = vsub.s32 0, %v3317_v43 }
  0xfb   :  { %2080 = vmatprep.subr.bf16.mxu0 %v3009_v12  ;;  %v336_v12 = vsub.s32 1, %v3317_v43 }
  0xfd   :  { %1564 = vmatpush1.bf16.msra.mxu1 %v2923_v9 }
  0xfe   :  { %1565 = vmatprep.subr.bf16.mxu1 %v2928_v11  ;;  %2081 = vmatpush1.bf16.msra.mxu0 %v3007_v14  ;;  %v3361_v11 = vld [vmem:[%s3404_s2] sm:$0xf] }
  0xff   :  { %2082 = vmatprep.subr.bf16.mxu0 %v3012_v17  ;;  %v3083_v17 = vld [vmem:[#allocation8] sm:$0xff]  }
 0x101   :  { %1566 = vmatpush1.bf16.msra.mxu1 %v2926_v13  ;;  %v333_v13 = vrot.slane %v3361_v11, %v332_v10 }
 0x102   :  { %1567 = vmatprep.subr.bf16.mxu1 %v2931_v15  ;;  %2083 = vmatpush1.bf16.msra.mxu0 %v3010_v20  ;;  %v3082_v15 = vld [vmem:[#allocation8 + $0x40] sm:$0xff]  }
 0x103   :  { %2084 = vmatprep.subr.bf16.mxu0 %v3015_v22 }
 0x105   :  { %1568 = vmatpush1.bf16.msra.mxu1 %v2929_v19  ;;  %v3084_v19 = vld [vmem:[#allocation8 + $0x48] sm:$0xff]  }
 0x106   :  { %1569 = vmatprep.subr.bf16.mxu1 %v2934_v21  ;;  %2085 = vmatpush1.bf16.msra.mxu0 %v3013_v24 }
 0x107   :  { %2086 = vmatprep.subr.bf16.mxu0 %v3018_v26  ;;  %v3085_v26 = vld [vmem:[#allocation8 + $0x8] sm:$0xff]  }
 0x109   :  { %1570 = vmatpush1.bf16.msra.mxu1 %v2932_v23 }
 0x10a   :  { %1580 = vmatprep.subr.bf16.mxu1 %v2937_v25  ;;  %2087 = vmatpush1.bf16.msra.mxu0 %v3016_v30  ;;  %v3086_v30 = vld [vmem:[#allocation8 + $0x50] sm:$0xff]  }
 0x10b   :  { %2088 = vmatprep.subr.bf16.mxu0 %v3021_v31 }
 0x10c   :  { %1572 = vmatmul.mubr.bf16.vlgmr.msra.gmra.mrb[4].mxu1 %v3329_v18  ;;  %v2944_v18 = vld [vmem:[#allocation5 + $0x468] ss:$16 sps:$4 sm:$0xff]  }
 0x10d   :  { %1581 = vmatpush1.bf16.msra.mxu1 %v2935_v28  ;;  %1612 = vmatprep.mubr.bf16.mxu1 %v3341_v51  ;;  %v3025_v51 = vld [vmem:[#allocation7 + $0xd0] ss:$8 sps:$4 sm:$0xff]  }
 0x10e   :  { %1582 = vmatprep.subr.bf16.mxu1 %v2940_v29  ;;  %2089 = vmatpush1.bf16.msra.mxu0 %v3019_v34  ;;  %v3087_v34 = vld [vmem:[#allocation8 + $0x10] sm:$0xff]  }
 0x10f   :  { %2090 = vmatprep.subr.bf16.mxu0 %v3024_v35 }
 0x111   :  { %1583 = vmatpush1.bf16.msra.mxu1 %v2938_v32 }
 0x112   :  { %1584 = vmatprep.subr.bf16.mxu1 %v2943_v33  ;;  %2091 = vmatpush1.bf16.msra.mxu0 %v3022_v38  ;;  %v3034_v33 = vld [vmem:[#allocation7 + $0x100] ss:$8 sps:$4 sm:$0xff]  }
 0x113   :  { %2092 = vmatprep.subr.bf16.mxu0 %v3027_v39 }
 0x115   :  { %1585 = vmatpush1.bf16.msra.mxu1 %v2941_v36  ;;  %v3039_v36 = vld [vmem:[#allocation7 + $0x114] ss:$8 sps:$4 sm:$0xff]  }
 0x116   :  { %1586 = vmatprep.subr.bf16.mxu1 %v2946_v37  ;;  %2093 = vmatpush1.bf16.msra.mxu0 %v3025_v51  ;;  %v3088_v37 = vld [vmem:[#allocation8 + $0x58] sm:$0xff]  }
 0x117   :  { %2094 = vmatprep.subr.bf16.mxu0 %v3030_v50  ;;  %v3089_v51 = vld [vmem:[#allocation8 + $0x18] sm:$0xff]   ;;  %v3046_v50 = vld [vmem:[#allocation7 + $0x140] ss:$8 sps:$4 sm:$0xff]  }
 0x119   :  { %1587 = vmatpush1.bf16.msra.mxu1 %v2944_v18  ;;  %v3037_v18 = vld [vmem:[#allocation7 + $0x110] ss:$8 sps:$4 sm:$0xff]  }
 0x11a   :  { %1588 = vmatprep.subr.bf16.mxu1 %v2949_v40  ;;  %2095 = vmatpush1.bf16.msra.mxu0 %v3028_v52  ;;  %v3051_v52 = vld [vmem:[#allocation7 + $0x154] ss:$8 sps:$4 sm:$0xff]  }
 0x11b   :  { %2096 = vmatprep.subr.bf16.mxu0 %v3033_v55  ;;  %v3052_v55 = vld [vmem:[#allocation7 + $0x160] ss:$8 sps:$4 sm:$0xff]  }
 0x11d   :  { %1589 = vmatpush1.bf16.msra.mxu1 %v2947_v41  ;;  %v3042_v41 = vld [vmem:[#allocation7 + $0x124] ss:$8 sps:$4 sm:$0xff]  }
 0x11e   :  { %1590 = vmatprep.subr.bf16.mxu1 %v2952_v16  ;;  %2097 = vmatpush1.bf16.msra.mxu0 %v3031_v56  ;;  %v3057_v56 = vld [vmem:[#allocation7 + $0x174] ss:$8 sps:$4 sm:$0xff]  }
 0x11f   :  { %2107 = vmatprep.subr.bf16.mxu0 %v3036_v59  ;;  %v3058_v59 = vld [vmem:[#allocation7 + $0x180] ss:$8 sps:$4 sm:$0xff]  }
 0x121   :  { %1591 = vmatpush1.bf16.msra.mxu1 %v2950_v42  ;;  %v3090_v42 = vld [vmem:[#allocation8 + $0x60] sm:$0xff]  }
 0x122   :  { %1592 = vmatprep.subr.bf16.mxu1 %v2955_v44  ;;  %v3040_v44 = vld [vmem:[#allocation7 + $0x120] ss:$8 sps:$4 sm:$0xff]  }
 0x125   :  { %1593 = vmatpush1.bf16.msra.mxu1 %v2953_v3  ;;  %v3091_v3 = vld [vmem:[#allocation8 + $0x20] sm:$0xff]  }
 0x126   :  { %1594 = vmatprep.subr.bf16.mxu1 %v2958_v45  ;;  %v3045_v45 = vld [vmem:[#allocation7 + $0x134] ss:$8 sps:$4 sm:$0xff]  }
 0x129   :  { %1595 = vmatpush1.bf16.msra.mxu1 %v2956_v49  ;;  %v3092_v49 = vld [vmem:[#allocation8 + $0x68] sm:$0xff]  }
 0x12a   :  { %1596 = vmatprep.subr.bf16.mxu1 %v2961_v46  ;;  %v3043_v46 = vld [vmem:[#allocation7 + $0x130] ss:$8 sps:$4 sm:$0xff]  }
 0x12d   :  { %1597 = vmatpush1.bf16.msra.mxu1 %v2959_v47  ;;  %v3093_v47 = vld [vmem:[#allocation8 + $0x28] sm:$0xff]  }
 0x12e   :  { %1598 = vmatprep.subr.bf16.mxu1 %v2964_v48  ;;  %v3048_v48 = vld [vmem:[#allocation7 + $0x144] ss:$8 sps:$4 sm:$0xff]  }
 0x131   :  { %1599 = vmatpush1.bf16.msra.mxu1 %v2962_v53  ;;  %v3049_v53 = vld [vmem:[#allocation7 + $0x150] ss:$8 sps:$4 sm:$0xff]  }
 0x132   :  { %1600 = vmatprep.subr.bf16.mxu1 %v2967_v54  ;;  %v3054_v54 = vld [vmem:[#allocation7 + $0x164] ss:$8 sps:$4 sm:$0xff]  }
 0x135   :  { %1601 = vmatpush1.bf16.msra.mxu1 %v2965_v57  ;;  %v3055_v57 = vld [vmem:[#allocation7 + $0x170] ss:$8 sps:$4 sm:$0xff]  }
 0x136   :  { %1602 = vmatprep.subr.bf16.mxu1 %v2970_v58  ;;  %v3060_v58 = vld [vmem:[#allocation7 + $0x184] ss:$8 sps:$4 sm:$0xff]  }
 0x139   :  { %1603 = vmatpush1.bf16.msra.mxu1 %v2968_v60  ;;  %v3063_v60 = vld [vmem:[#allocation7 + $0x194] ss:$8 sps:$4 sm:$0xff]  }
 0x13a   :  { %1604 = vmatprep.subr.bf16.mxu1 %v2973_v61  ;;  %v3061_v61 = vld [vmem:[#allocation7 + $0x190] ss:$8 sps:$4 sm:$0xff]  }
 0x13d   :  { %1605 = vmatpush1.bf16.msra.mxu1 %v2971_v62  ;;  %v3066_v62 = vld [vmem:[#allocation7 + $0x1a4] ss:$8 sps:$4 sm:$0xff]  }
 0x13e   :  { %1606 = vmatprep.subr.bf16.mxu1 %v2976_v63  ;;  %v3064_v63 = vld [vmem:[#allocation7 + $0x1a0] ss:$8 sps:$4 sm:$0xff]  }
 0x141   :  { %1607 = vmatpush1.bf16.msra.mxu1 %v2974_v0  ;;  %v3069_v0 = vld [vmem:[#allocation7 + $0x1b4] ss:$8 sps:$4 sm:$0xff]  }
 0x142   :  { %1608 = vmatprep.subr.bf16.mxu1 %v2979_v1  ;;  %v3067_v1 = vld [vmem:[#allocation7 + $0x1b0] ss:$8 sps:$4 sm:$0xff]  }
 0x145   :  { %1609 = vmatpush1.bf16.msra.mxu1 %v2977_v2  ;;  %v3072_v2 = vld [vmem:[#allocation7 + $0x1c4] ss:$8 sps:$4 sm:$0xff]  }
 0x146   :  { %1610 = vmatprep.subr.bf16.mxu1 %v2985_v4  ;;  %v3070_v4 = vld [vmem:[#allocation7 + $0x1c0] ss:$8 sps:$4 sm:$0xff]  }
 0x149   :  { %1611 = vmatpush1.bf16.msra.mxu1 %v2983_v5  ;;  %v3075_v5 = vld [vmem:[#allocation7 + $0x1d4] ss:$8 sps:$4 sm:$0xff]  }
 0x14a   :  { %2625 = vmatprep.subr.bf16.mxu1 %v3082_v15 }
 0x14c   :  { %1613 = vmatmul.mubr.bf16.vlgmr.msra.gmra.mrb[4].mxu1 %v3346_v27  ;;  %v337_v27 = vrot.slane %v3361_v11, %v336_v12 }
 0x14d   :  { %2626 = vmatpush3.bf16.msra.mxu1 %v3083_v17 }
 0x14e   :  { %2627 = vmatprep.subr.bf16.mxu1 %v3084_v19 }
 0x151   :  { %2628 = vmatpush3.bf16.msra.mxu1 %v3085_v26 }
 0x152   :  { %2629 = vmatprep.subr.bf16.mxu1 %v3086_v30 }
 0x155   :  { %2630 = vmatpush3.bf16.msra.mxu1 %v3087_v34  ;;  %v3097_v34 = vld [vmem:[#allocation8 + $0x38] sm:$0xff]  }
 0x156   :  { %2631 = vmatprep.subr.bf16.mxu1 %v3088_v37 }
 0x159   :  { %2632 = vmatpush3.bf16.msra.mxu1 %v3089_v51 }
 0x15a   :  { %2633 = vmatprep.subr.bf16.mxu1 %v3090_v42 }
 0x15d   :  { %2634 = vmatpush3.bf16.msra.mxu1 %v3091_v3 }
 0x15e   :  { %2635 = vmatprep.subr.bf16.mxu1 %v3092_v49 }
 0x15f   :  { %v1368_v6 = vpop.f32.mrb[0].mxu1 }
 0x160   :  { %v1370_v7 = vpop.f32.mrb[1].mxu1  ;;  %v1369_v14 = vadd.f32 %v1368_v6, %v333_v13  ;;  %v3073_v6 = vld [vmem:[#allocation7 + $0x1d0] ss:$8 sps:$4 sm:$0xff]  }
 0x161   :  { %v1372_v8 = vpop.f32.mrb[2].mxu1  ;;  %v1371_v20 = vadd.f32 %v1370_v7, %v337_v27  ;;  %2636 = vmatpush3.bf16.msra.mxu1 %v3093_v47  ;;  %v3078_v7 = vld [vmem:[#allocation7 + $0x1e4] ss:$8 sps:$4 sm:$0xff]   ;;  %v3079_v13 = vld [vmem:[#allocation7 + $0x1f0] ss:$8 sps:$4 sm:$0xff]   ;;  %v340_v27 = vsub.s32 2, %v3317_v43 }
 0x162   :  { %v1373_v9 = vpop.f32.mrb[3].mxu1  ;;  %v3076_v8 = vld [vmem:[#allocation7 + $0x1e0] ss:$8 sps:$4 sm:$0xff]  }
 0x163   :  { %v3081_v9 = vld [vmem:[#allocation7 + $0x1f4] ss:$8 sps:$4 sm:$0xff]   ;;  %v341_v15 = vrot.slane %v3361_v11, %v340_v27 }
 0x1ac   :  { %v1491_v21 = vpop.f32.mrb[0].mxu0 }
 0x1ad   :  { %v2648_v22 = vadd.f32 %v1491_v21, %v1369_v14  ;;  %v1493_v23 = vpop.f32.mrb[1].mxu0  ;;  %v344_v14 = vsub.s32 3, %v3317_v43 }
 0x1ae   :  { %v2650_v24 = vadd.f32 %v1493_v23, %v1371_v20  ;;  %v1495_v25 = vpop.f32.mrb[2].mxu0 }
 0x1af   :  { %v1662_v28 = vmax.f32 %v2648_v22, 0.0  ;;  %v1496_v29 = vpop.f32.mrb[3].mxu0  ;;  %v345_v17 = vrot.slane %v3361_v11, %v344_v14  ;;  %v3096_v11 = vld [vmem:[#allocation8 + $0x78] sm:$0xff]  }
 0x1b0   :  { %v1663_v31 = vmax.f32 %v2650_v24, 0.0 }
 0x1b1   :  { %v1666_v35 = vpack.c.bf16 %v1662_v28, %v1662_v28 }
 0x1b2   :  { %v1667_v32 = vpack.c.bf16 %v1663_v31, %v1663_v31 }
 0x1b4   :  { %2098 = vmatprep.mubr.bf16.mxu0 %v1667_v32  ;;  %v3370_v38 = vpop.f32.mrb[4].mxu0  ;;  %v3094_v32 = vld [vmem:[#allocation8 + $0x70] sm:$0xff]  }
 0x1b5   :  { %2099 = vmatmul.mubr.bf16.vlgmr.msra.gmra.mrb[8].mxu0 %v1666_v35  ;;  %v3372_v39 = vpop.f32.mrb[5].mxu0  ;;  %2637 = vmatprep.subr.bf16.mxu1 %v3094_v32  ;;  %v1734_v35 = vld [vmem:[%s3406_s4] sm:$0x3] }
 0x1b6   :  { %2108 = vmatpush1.bf16.msra.mxu0 %v3034_v33  ;;  %v1659_v40 = vpop.f32.mrb[6].mxu0  ;;  %v3095_v33 = vld [vmem:[#allocation8 + $0x30] sm:$0xff]   ;;  %v1743_v37 = vrot.slane %v1734_v35, %v336_v12 }
 0x1b7   :  { %2109 = vmatprep.subr.bf16.mxu0 %v3039_v36  ;;  %v1660_v16 = vpop.f32.mrb[7].mxu0  ;;  %2638 = vmatpush3.bf16.msra.mxu1 %v3095_v33  ;;  %v1739_v36 = vrot.slane %v1734_v35, %v332_v10  ;;  %v2608_v10 = vld [vmem:[%s3408_s6] ss:$0 sm:$0xff] }
 0x1b8   :  { %2639 = vmatprep.subr.bf16.mxu1 %v3096_v11 }
 0x1ba   :  { %2110 = vmatpush1.bf16.msra.mxu0 %v3037_v18 }
 0x1bb   :  { %2111 = vmatprep.subr.bf16.mxu0 %v3042_v41  ;;  %2640 = vmatpush3.bf16.msra.mxu1 %v3097_v34 }
 0x1be   :  { %2112 = vmatpush1.bf16.msra.mxu0 %v3040_v44 }
 0x1bf   :  { %2113 = vmatprep.subr.bf16.mxu0 %v3045_v45 }
 0x1c2   :  { %2114 = vmatpush1.bf16.msra.mxu0 %v3043_v46 }
 0x1c3   :  { %2115 = vmatprep.subr.bf16.mxu0 %v3048_v48 }
 0x1c6   :  { %2116 = vmatpush1.bf16.msra.mxu0 %v3046_v50 }
 0x1c7   :  { %2117 = vmatprep.subr.bf16.mxu0 %v3051_v52 }
 0x1ca   :  { %2118 = vmatpush1.bf16.msra.mxu0 %v3049_v53 }
 0x1cb   :  { %2119 = vmatprep.subr.bf16.mxu0 %v3054_v54 }
 0x1ce   :  { %2120 = vmatpush1.bf16.msra.mxu0 %v3052_v55 }
 0x1cf   :  { %2121 = vmatprep.subr.bf16.mxu0 %v3057_v56 }
 0x1d2   :  { %2122 = vmatpush1.bf16.msra.mxu0 %v3055_v57 }
 0x1d3   :  { %2123 = vmatprep.subr.bf16.mxu0 %v3060_v58 }
 0x1d6   :  { %2124 = vmatpush1.bf16.msra.mxu0 %v3058_v59 }
 0x1d7   :  { %2125 = vmatprep.subr.bf16.mxu0 %v3063_v60 }
 0x1da   :  { %2126 = vmatpush1.bf16.msra.mxu0 %v3061_v61 }
 0x1db   :  { %2127 = vmatprep.subr.bf16.mxu0 %v3066_v62 }
 0x1de   :  { %2128 = vmatpush1.bf16.msra.mxu0 %v3064_v63 }
 0x1df   :  { %2129 = vmatprep.subr.bf16.mxu0 %v3069_v0 }
 0x1e2   :  { %2130 = vmatpush1.bf16.msra.mxu0 %v3067_v1 }
 0x1e3   :  { %2131 = vmatprep.subr.bf16.mxu0 %v3072_v2 }
 0x1e6   :  { %2132 = vmatpush1.bf16.msra.mxu0 %v3070_v4 }
 0x1e7   :  { %2133 = vmatprep.subr.bf16.mxu0 %v3075_v5 }
 0x1ea   :  { %2134 = vmatpush1.bf16.msra.mxu0 %v3073_v6 }
 0x1eb   :  { %2135 = vmatprep.subr.bf16.mxu0 %v3078_v7 }
 0x1ee   :  { %2136 = vmatpush1.bf16.msra.mxu0 %v3076_v8 }
 0x1ef   :  { %2137 = vmatprep.subr.bf16.mxu0 %v3081_v9 }
 0x1f2   :  { %2138 = vmatpush1.bf16.msra.mxu0 %v3079_v13 }
 0x21f   :  { %v1614_v19 = vpop.f32.mrb[4].mxu1 }
 0x220   :  { %v2651_v20 = vadd.f32 %v1614_v19, %v341_v15  ;;  %v1616_v21 = vpop.f32.mrb[5].mxu1 }
 0x221   :  { %v2653_v22 = vadd.f32 %v1616_v21, %v345_v17  ;;  %v1618_v23 = vpop.f32.mrb[6].mxu1 }
 0x222   :  { %v2652_v24 = vadd.f32 %v2651_v20, %v3370_v38  ;;  %v1619_v25 = vpop.f32.mrb[7].mxu1 }
 0x223   :  { %v2654_v26 = vadd.f32 %v2653_v22, %v3372_v39 }
 0x224   :  { %v1664_v28 = vmax.f32 %v2652_v24, 0.0 }
 0x225   :  { %v1665_v29 = vmax.f32 %v2654_v26, 0.0 }
 0x226   :  { %v1668_v31 = vpack.c.bf16 %v1664_v28, %v1664_v28 }
 0x227   :  { %v1669_v30 = vpack.c.bf16 %v1665_v29, %v1665_v29 }
 0x229   :  { %2139 = vmatprep.mubr.bf16.mxu0 %v1669_v30 }
 0x22a   :  { %2140 = vmatmul.mubr.bf16.vlgmr.msra.gmra.mrb[8].mxu0 %v1668_v31 }
 0x2fd   :  { %v2141_v38 = vpop.f32.mrb[8].mxu0 }
 0x2fe   :  { %v2655_v39 = vadd.f32 %v2141_v38, %v1739_v36  ;;  %v2143_v18 = vpop.f32.mrb[9].mxu0 }
 0x2ff   :  { %v2656_v40 = vadd.f32 %v2143_v18, %v1743_v37  ;;  %v2145_v51 = vpop.f32.mrb[10].mxu0 }
 0x300   :  { %v2148_v41 = vmax.f32 %v2655_v39, 0.0  ;;  %v2146_v16 = vpop.f32.mrb[11].mxu0 }
 0x301   :  { %v2149_v42 = vmax.f32 %v2656_v40, 0.0 }
 0x302   :  { %v2150_v3 = vpack.c.bf16 %v2148_v41, %v2148_v41 }
 0x303   :  { %v2151_v44 = vpack.c.bf16 %v2149_v42, %v2149_v42 }
 0x305   :  { %2319 = vmatprep.mubr.bf16.mxu1 %v2151_v44 }
 0x306   :  { %2320 = vmatmul.mubr.bf16.vlgmr.msra.gmra.mrb[8].mxu1 %v2150_v3 }
 0x3d9   :  { %v2641_v45 = vpop.f32.mrb[8].mxu1 }
 0x3da   :  { %v2642_v49 = vpop.f32.mrb[9].mxu1 }
 0x3db   :  { %v2643_v43 = vadd.f32 %v2642_v49, %v2641_v45  ;;  %v2644_v12 = vpop.f32.mrb[10].mxu1 }
 0x3dc   :  { %v2645_v46 = vpop.f32.mrb[11].mxu1 }
 0x3dd   :  { %v2322_v47 = vadd.f32 %v2643_v43, %v2608_v10 }
 0x3df   :  { %v2327_v48 = vpack.c.bf16 %v2322_v47, %v2322_v47 }
 0x3e1   :  { %2328 = vst [vmem:[#allocation10] sm:$0x1] %v2327_v48 }
 0x3e2   :  { %3197 = shalt.err (!%p3194_p8)
}
 0x3e3   :  { %s3198_s0 = scalar_lea.hbm %s3409_s7, 16 }
 0x3e4   :  { %p3199_p9 = scmp.ne.s32.totalorder %s3409_s7, %s3198_s0  ;;  %p3202_p10 = scmp.lt.u32.totalorder %s3198_s0, %s3409_s7 }
 0x3e6   :  { %p3204_p11 = pnand %p3202_p10, %p3199_p9 }
 0x3e8   :  { %3207 = shalt.err (!%p3204_p11)
}
 0x3e9   :  { %2338 = dma.vmem_to_hbm [thread:$0]  %s2336_s9, 16, %s3409_s7, [#allocation4]  }
 0x3ea   :  { %3214 = dma.done.wait [#allocation4], 16  }
 0x3eb   :  { %3215 = vsyncadd [#allocation4], 4294967280 }
 0x3ec   :  { %2342 = vsyncpa [#allocation3], 1 }
 0x3ed   :  { %2343 = vsyncpa [#allocation6], 1 }
 0x3ee   :  { %2344 = vsyncpa [#allocation9], 1 }
 0x3ef   :  { %2345 = vsyncpa [#allocation4], 1 }

</bundles_post_ra>
